<compile_context>
chip_gen: v7x
topology: tpu7x:2x2x1
jax: 0.10.0
libtpu: 0.0.40
codegen_flags: <defaults>
</compile_context>

<pallas_src>
import jax
import jax.numpy as jnp
from jax.experimental import pallas as pl
from jax.experimental.pallas import tpu as pltpu


def moe_kernel(x_ref, gate_ref, gcol_ref, we_ref, be_ref, o_ref, acc_ref):
    # grid = (i over batch tiles, j over Fout tiles, e over experts)
    e = pl.program_id(2)
    last_e = pl.num_programs(2) - 1

    @pl.when(e == 0)
    def _init():
        # Fold ALL expert biases with one small matmul:
        #   sum_e gate[:, e] * be[e, :]  ==  gate @ be
        acc_ref[...] = jnp.dot(
            gate_ref[...].astype(jnp.float32),
            be_ref[...].astype(jnp.float32),
            preferred_element_type=jnp.float32,
        )                                                          # (TM, TN)

    # Expert-e contribution on the MXU, f32 accumulation.
    y_e = jnp.dot(x_ref[...], we_ref[...],
                  preferred_element_type=jnp.float32)              # (TM, TN)
    # gcol_ref is the gate column for expert e, shape (TM, 1) — streamed in by
    # BlockSpec, no in-kernel masking / transpose needed.
    acc_ref[...] += gcol_ref[...].astype(jnp.float32) * y_e

    @pl.when(e == last_e)
    def _finalize():
        o_ref[...] = acc_ref[...].astype(o_ref.dtype)


def basic_moe(x, wg, bg, we, be, *, tm=None, tn=None, compute_dtype=None):
    """x: (B, Fin); wg: (Fin, E); bg: (1, E) or (E,); we: (E, Fin, Fout); be: (E, Fout)."""
    B, Fin = x.shape
    E, Fin2, Fout = we.shape
    assert Fin2 == Fin
    if bg.ndim == 1:
        bg = bg.reshape(1, E)

    # --- gate logits in plain XLA (hoisted out of the kernel; no softmax) ---
    gate = (x.astype(jnp.float32) @ wg.astype(jnp.float32)
            + bg.astype(jnp.float32))                              # (B, E) f32
    gate_col = jnp.transpose(gate)[:, :, None]                     # (E, B, 1) f32

    # --- bandwidth-dominant tensors optionally in bf16 (f32 accumulation) ---
    x_c = x if compute_dtype is None else x.astype(compute_dtype)
    we_c = we if compute_dtype is None else we.astype(compute_dtype)
    ix, iw, io = x_c.dtype.itemsize, we_c.dtype.itemsize, x.dtype.itemsize

    # --- tile selection: largest MXU-friendly tiles that divide the problem ---
    if tm is None:
        tm = next((c for c in (512, 256, 128) if B % c == 0), B)
    if tn is None:
        tn = next((c for c in (512, 256, 128) if Fout % c == 0), Fout)

    # Generation-aware VMEM budget (v7x has only 64 MiB/TC).
    try:
        vmem_cap = pltpu.get_tpu_info().vmem_capacity_bytes
    except Exception:
        vmem_cap = 64 << 20                         # conservative (v7x)
    vmem_budget = int(vmem_cap * 0.7)

    def est_vmem(tm_, tn_):
        buffered = (tm_ * Fin * ix        # x
                    + Fin * tn_ * iw      # expert weight slice
                    + tm_ * E * 4         # gate tile
                    + tm_ * 4             # gate column
                    + E * tn_ * 4         # be tile
                    + tm_ * tn_ * io)     # output tile
        return 2 * buffered + tm_ * tn_ * 4          # double buffers + f32 acc

    # Shrink tn first (keeps arithmetic intensity from tm), then tm.
    while est_vmem(tm, tn) > vmem_budget:
        if tn > 128 and (tn // 2) % 128 == 0 and Fout % (tn // 2) == 0:
            tn //= 2
        elif tm > 128 and (tm // 2) % 8 == 0 and B % (tm // 2) == 0:
            tm //= 2
        else:
            break

    # v7x megacore: avoid a fully degenerate (1, 1, E) parallel grid if we can.
    if B // tm == 1 and Fout // tn == 1:
        if tn % 2 == 0 and (tn // 2) % 128 == 0 and Fout % (tn // 2) == 0:
            tn //= 2
        elif tm % 2 == 0 and (tm // 2) % 8 == 0 and B % (tm // 2) == 0:
            tm //= 2

    assert B % tm == 0 and Fout % tn == 0, (
        "tm/tn must evenly divide batch / feature_out (no remainder handling)")

    num_i, num_j = B // tm, Fout // tn
    grid = (num_i, num_j, E)

    needed = est_vmem(tm, tn)
    vmem_limit = min(max(int(needed * 1.25) + (2 << 20), 32 << 20), 100 << 20)

    # Advisory cost estimate reflecting the true HBM traffic (we is re-read
    # once per batch tile, gate columns once per Fout tile).
    flops = 2 * B * Fin * Fout * E + 4 * B * E * Fout
    bytes_accessed = int(
        B * Fin * ix                                  # x (read once per i)
        + E * Fin * Fout * iw * num_i                 # we re-read per batch tile
        + B * E * 4                                   # gate
        + B * E * 4 * num_j                           # gate columns per j tile
        + E * Fout * be.dtype.itemsize * num_i        # be per batch tile
        + B * Fout * io                               # output
    )

    return pl.pallas_call(
        moe_kernel,
        out_shape=jax.ShapeDtypeStruct((B, Fout), x.dtype),
        grid_spec=pltpu.PrefetchScalarGridSpec(
            num_scalar_prefetch=0,
            grid=grid,
            in_specs=[
                pl.BlockSpec((tm, Fin), lambda i, j, e: (i, 0)),              # x
                pl.BlockSpec((tm, E), lambda i, j, e: (i, 0)),                # gate
                pl.BlockSpec((pl.Squeezed(), tm, 1),
                             lambda i, j, e: (e, i, 0)),                      # gate column e
                pl.BlockSpec((pl.Squeezed(), Fin, tn),
                             lambda i, j, e: (e, 0, j)),                      # expert weights
                pl.BlockSpec((E, tn), lambda i, j, e: (0, j)),                # expert biases
            ],
            out_specs=pl.BlockSpec((tm, tn), lambda i, j, e: (i, j)),
            scratch_shapes=[
                pltpu.VMEM((tm, tn), jnp.float32),    # f32 accumulator
            ],
        ),
        compiler_params=pltpu.CompilerParams(
            dimension_semantics=("parallel", "parallel", "arbitrary"),
            vmem_limit_bytes=vmem_limit,
        ),
        cost_estimate=pl.CostEstimate(
            flops=flops, transcendentals=0, bytes_accessed=bytes_accessed
        ),
    )(x_c, gate, gate_col, we_c, be)


def init_params(key, feature_in, feature_out, expert_number, dtype=jnp.float32):
    """Deterministic nn.Linear-style init (uniform in +/- 1/sqrt(fan_in))."""
    k1, k2, k3, k4 = jax.random.split(key, 4)
    bound = 1.0 / (feature_in ** 0.5)
    wg = jax.random.uniform(k1, (feature_in, expert_number), dtype, -bound, bound)
    bg = jax.random.uniform(k2, (1, expert_number), dtype, -bound, bound)
    we = jax.random.uniform(k3, (expert_number, feature_in, feature_out), dtype, -bound, bound)
    be = jax.random.uniform(k4, (expert_number, feature_out), dtype, -bound, bound)
    return wg, bg, we, be


def moe_ref(x, wg, bg, we, be):
    """Pure-JAX reference matching the PyTorch forward."""
    gate = x @ wg + bg                                   # (B, E)
    expert_out = jnp.einsum("bi,eio->beo", x, we) + be   # (B, E, Fout)
    return jnp.einsum("be,beo->bo", gate, expert_out)    # (B, Fout)


if __name__ == "__main__":
    batch, feature_in, feature_out, expert_number = 8, 32, 64, 4

    key = jax.random.PRNGKey(0)
    kx, kp = jax.random.split(key)
    x = jax.random.normal(kx, (batch, feature_in), jnp.float32)
    wg, bg, we, be = init_params(kp, feature_in, feature_out, expert_number)

    ref = moe_ref(x, wg, bg, we, be)

    # Full-precision path.
    out = basic_moe(x, wg, bg, we, be)
    jax.block_until_ready(out)
    assert out.shape == (batch, feature_out)
    assert jnp.allclose(out, ref, atol=1e-4, rtol=1e-4)

    # bf16 weights/activations (f32 accumulation) — bandwidth-optimized path.
    out_bf16 = basic_moe(x, wg, bg, we, be, compute_dtype=jnp.bfloat16)
    jax.block_until_ready(out_bf16)
    assert jnp.allclose(out_bf16, ref, atol=5e-2, rtol=5e-2)

    print("KERNEL_OK")
</pallas_src>

<mosaic_0001>
module attributes {stable_mosaic.version = 11 : i64} {
  func.func @moe_kernel(%arg0: i32, %arg1: i32, %arg2: i32, %arg3: memref<8x32xf32, #tpu.memory_space<vmem>>, %arg4: memref<8x4xf32, #tpu.memory_space<vmem>>, %arg5: memref<1x8x1xf32, #tpu.memory_space<vmem>>, %arg6: memref<1x32x64xf32, #tpu.memory_space<vmem>>, %arg7: memref<4x64xf32, #tpu.memory_space<vmem>>, %arg8: memref<8x64xf32, #tpu.memory_space<vmem>>, %arg9: memref<8x64xf32, #tpu.memory_space<vmem>>) attributes {dimension_semantics = [#tpu.dimension_semantics<parallel>, #tpu.dimension_semantics<parallel>, #tpu.dimension_semantics<arbitrary>], iteration_bounds = array<i64: 1, 1, 4>, scalar_prefetch = 0 : i64, scratch_operands = 1 : i64, tpu.core_type = #tpu.core_type<tc>, window_params = [{transform_indices = @transform_0, window_bounds = array<i64: 8, 32>}, {transform_indices = @transform_1, window_bounds = array<i64: 8, 4>}, {transform_indices = @transform_2, window_bounds = array<i64: 1, 8, 1>}, {transform_indices = @transform_3, window_bounds = array<i64: 1, 32, 64>}, {transform_indices = @transform_4, window_bounds = array<i64: 4, 64>}, {transform_indices = @transform_5, window_bounds = array<i64: 8, 64>}]} {
    %c0_i32 = arith.constant 0 : i32
    %0 = arith.cmpi eq, %arg2, %c0_i32 : i32
    %1 = arith.extui %0 : i1 to i32
    %c0_i32_0 = arith.constant 0 : i32
    %2 = arith.cmpi ne, %1, %c0_i32_0 : i32
    scf.if %2 {
      %c0_13 = arith.constant 0 : index
      %c0_14 = arith.constant 0 : index
      %17 = vector.load %arg4[%c0_13, %c0_14] : memref<8x4xf32, #tpu.memory_space<vmem>>, vector<8x4xf32>
      %c0_15 = arith.constant 0 : index
      %c0_16 = arith.constant 0 : index
      %18 = vector.load %arg7[%c0_15, %c0_16] : memref<4x64xf32, #tpu.memory_space<vmem>>, vector<4x64xf32>
      %cst_17 = arith.constant dense<0.000000e+00> : vector<8x64xf32>
      %19 = tpu.matmul %17, %18, %cst_17 {dimension_numbers = #tpu.dot_dimension_numbers<[1], [0], [0], [1], [0, 0, 1, 1], [], []>} : vector<8x4xf32>, vector<4x64xf32>, vector<8x64xf32> -> vector<8x64xf32>
      %c0_18 = arith.constant 0 : index
      %c0_19 = arith.constant 0 : index
      %20 = vector.load %arg9[%c0_18, %c0_19] : memref<8x64xf32, #tpu.memory_space<vmem>>, vector<8x64xf32>
      tpu.vector_store %arg9[%c0_18, %c0_19], %19 {strides = array<i32>} : memref<8x64xf32, #tpu.memory_space<vmem>>, vector<8x64xf32>,
    } else {
    }
    %c0 = arith.constant 0 : index
    %c0_1 = arith.constant 0 : index
    %3 = vector.load %arg3[%c0, %c0_1] : memref<8x32xf32, #tpu.memory_space<vmem>>, vector<8x32xf32>
    %c0_2 = arith.constant 0 : index
    %c0_3 = arith.constant 0 : index
    %c0_4 = arith.constant 0 : index
    %4 = vector.load %arg6[%c0_2, %c0_3, %c0_4] : memref<1x32x64xf32, #tpu.memory_space<vmem>>, vector<1x32x64xf32>
    %5 = vector.shape_cast %4 : vector<1x32x64xf32> to vector<32x64xf32>
    %cst = arith.constant dense<0.000000e+00> : vector<8x64xf32>
    %6 = tpu.matmul %3, %5, %cst {dimension_numbers = #tpu.dot_dimension_numbers<[1], [0], [0], [1], [0, 0, 1, 1], [], []>} : vector<8x32xf32>, vector<32x64xf32>, vector<8x64xf32> -> vector<8x64xf32>
    %c0_5 = arith.constant 0 : index
    %c0_6 = arith.constant 0 : index
    %7 = vector.load %arg9[%c0_5, %c0_6] : memref<8x64xf32, #tpu.memory_space<vmem>>, vector<8x64xf32>
    %c0_7 = arith.constant 0 : index
    %c0_8 = arith.constant 0 : index
    %c0_9 = arith.constant 0 : index
    %8 = vector.load %arg5[%c0_7, %c0_8, %c0_9] : memref<1x8x1xf32, #tpu.memory_space<vmem>>, vector<1x8x1xf32>
    %9 = vector.shape_cast %8 : vector<1x8x1xf32> to vector<8x1xf32>
    %10 = vector.broadcast %9 : vector<8x1xf32> to vector<8x64xf32>
    %11 = arith.mulf %10, %6 : vector<8x64xf32>
    %12 = arith.addf %7, %11 : vector<8x64xf32>
    %c0_10 = arith.constant 0 : index
    %c0_11 = arith.constant 0 : index
    %13 = vector.load %arg9[%c0_10, %c0_11] : memref<8x64xf32, #tpu.memory_space<vmem>>, vector<8x64xf32>
    tpu.vector_store %arg9[%c0_10, %c0_11], %12 {strides = array<i32>} : memref<8x64xf32, #tpu.memory_space<vmem>>, vector<8x64xf32>,
    %c3_i32 = arith.constant 3 : i32
    %14 = arith.cmpi eq, %arg2, %c3_i32 : i32
    %15 = arith.extui %14 : i1 to i32
    %c0_i32_12 = arith.constant 0 : i32
    %16 = arith.cmpi ne, %15, %c0_i32_12 : i32
    scf.if %16 {
      %c0_13 = arith.constant 0 : index
      %c0_14 = arith.constant 0 : index
      %17 = vector.load %arg9[%c0_13, %c0_14] : memref<8x64xf32, #tpu.memory_space<vmem>>, vector<8x64xf32>
      %c0_15 = arith.constant 0 : index
      %c0_16 = arith.constant 0 : index
      %18 = vector.load %arg8[%c0_15, %c0_16] : memref<8x64xf32, #tpu.memory_space<vmem>>, vector<8x64xf32>
      tpu.vector_store %arg8[%c0_15, %c0_16], %17 {strides = array<i32>} : memref<8x64xf32, #tpu.memory_space<vmem>>, vector<8x64xf32>,
    } else {
    }
    return
  }
  func.func @transform_0(%arg0: i32, %arg1: i32, %arg2: i32) -> (i32, i32) {
    %c0_i32 = arith.constant 0 : i32
    %c0_i32_0 = arith.constant 0 : i32
    return %arg0, %c0_i32 : i32, i32
  }
  func.func @transform_1(%arg0: i32, %arg1: i32, %arg2: i32) -> (i32, i32) {
    %c0_i32 = arith.constant 0 : i32
    %c0_i32_0 = arith.constant 0 : i32
    return %arg0, %c0_i32 : i32, i32
  }
  func.func @transform_2(%arg0: i32, %arg1: i32, %arg2: i32) -> (i32, i32, i32) {
    %c0_i32 = arith.constant 0 : i32
    %c0_i32_0 = arith.constant 0 : i32
    return %arg2, %arg0, %c0_i32 : i32, i32, i32
  }
  func.func @transform_3(%arg0: i32, %arg1: i32, %arg2: i32) -> (i32, i32, i32) {
    %c0_i32 = arith.constant 0 : i32
    %c0_i32_0 = arith.constant 0 : i32
    return %arg2, %c0_i32, %arg1 : i32, i32, i32
  }
  func.func @transform_4(%arg0: i32, %arg1: i32, %arg2: i32) -> (i32, i32) {
    %c0_i32 = arith.constant 0 : i32
    %c0_i32_0 = arith.constant 0 : i32
    return %c0_i32, %arg1 : i32, i32
  }
  func.func @transform_5(%arg0: i32, %arg1: i32, %arg2: i32) -> (i32, i32) {
    %c0_i32 = arith.constant 0 : i32
    return %arg0, %arg1 : i32, i32
  }
}

</mosaic_0001>

<bundles_post_ra>
// kernel: tpu_custom_call.1
= control target key start
LH: loop header
LB: loop body
LE: loop exit
PB: predicated region body
PF: predicated region fallthrough
CT: control target
= control target key end

     0   :  { %10 = vsyncpa [#allocation4], 0  ;;  %s1097_s0 = inlined_call_operand.vmem [shape: f32[8,32], index: 0, kind: input, shape index: {}]   ;;  %s1098_s1 = inlined_call_operand.vmem [shape: f32[8,4], index: 1, kind: input, shape index: {}]   ;;  %s1099_s2 = inlined_call_operand.vmem [shape: f32[4,8,1], index: 2, kind: input, shape index: {}]   ;;  %s1100_s3 = inlined_call_operand.hbm [shape: f32[4,32,64], index: 3, kind: input, shape index: {}]   ;;  %s1101_s4 = inlined_call_operand.vmem [shape: f32[4,64], index: 4, kind: input, shape index: {}]   ;;  %s1102_s5 = inlined_call_operand.hbm [shape: f32[8,64], index: 5, kind: output, shape index: {}]  }
   0x1   :  { %12 = vsyncpa [#allocation4 + $0x1], 0 }
   0x2   :  { %13 = vsyncpa [#allocation5], 0  ;;  %s932_s18 = smov 0   ;;  %s934_s19 = smov 0  }
   0x3   :  { %s936_s20 = smov 0   ;;  %s938_s21 = smov 0  }
   0x4   :  { %s940_s22 = smov 0   ;;  %s942_s23 = smov 0  }
   0x5 LB: > { %s658_s24 = sadd.s32 4294967295, %s890_s23   ;;  %s31_s25 = sadd.s32 1, %s886_s22  ;;  %s890_s23 = sphi %s942_s23, %s19_s23   ;;  %s886_s22 = sphi %s940_s22, %s1111_s22   ;;  %s882_s21 = sphi %s938_s21, %s1110_s21   ;;  %s878_s20 = sphi %s936_s20, %s1109_s20   ;;  %s874_s19 = sphi %s934_s19, %s1108_s19   ;;  %s870_s18 = sphi %s932_s18, %s1107_s18  }
   0x6   : > { %p32_p0 = scmp.ge.s32.totalorder %s31_s25, 4  ;;  %s127_s26 = sadd.s32 1, %s878_s20 }
   0x7   : > { %p134_p1 = scmp.ne.s32.totalorder %s878_s20, %s874_s19  ;;  %p135_p2 = scmp.eq.s32.totalorder %s890_s23, 0 }
   0x8   : > { %s1113_s25 = smov (%p32_p0, %s31_s25), 0  ;;  %p140_p4 = scmp.ne.s32.totalorder %s874_s19, %s870_s18 }
   0x9   : > { %p968_p3 = por %p135_p2, %p134_p1  ;;  %s122_s28 = ssub.s32 %s886_s22, %s1113_s25 }
   0xa   : > { %p141_p5 = scmp.eq.s32.totalorder %s658_s24, 0  ;;  %p125_p6 = scmp.eq.s32.totalorder %s122_s28, 0 }
   0xb   : > { %p719_p8 = scmp.lt.s32.totalorder %s890_s23, 4  ;;  %s249_s6 = sand.u32 1, %s878_s20  }
   0xc   : > { %p977_p7 = por %p141_p5, %p140_p4  ;;  %s679_s7 = sshll.u32 %s886_s22, 9 }
   0xd   : > { %s983_s30 = scalar_select %p125_p6, %s878_s20, %s127_s26  }
   0xe   : > { %s664_s8 = sshll.u32 %s249_s6, 5  ;;  %s990_s11 = scalar_lea.hbm %s1100_s3, %s679_s7 }
   0xf   : > { %s253_s12 = scalar_lea.vmem [#allocation3], %s664_s8  ;;  %p994_p9 = pnand %p719_p8, %p968_p3 }
  0x10   : > { %s261_s13 = sshll.u32 %s253_s12, 4  ;;  %s1000_s15 = scalar_lea.sflag [#allocation4], %s249_s6  ;;  %s998_s13 = int_to_ptr.vmem [resolvable:$true] %s261_s13 }
  0x11   : > { %s780_s16 = scalar_lea.hbm %s990_s11, 512  ;;  %p782_p11 = pneg %p994_p9 }
  0x12   : > { %p781_p10 = scmp.ne.s32.totalorder %s990_s11, %s780_s16  ;;  %s785_s26 = scalar_lea.hbm %s1100_s3, 2048 }
  0x13   : > { %p786_p0 = scmp.lt.u32.totalorder %s990_s11, %s1100_s3  ;;  %p787_p1 = scmp.lt.u32.totalorder %s785_s26, %s780_s16 }
  0x14   : > { %p783_p12 = pnand %p782_p11, %p781_p10  ;;  %p789_p3 = scmp.lt.u32.totalorder %s780_s16, %s990_s11 }
  0x15   : > { %p788_p2 = por %p787_p1, %p786_p0 }
  0x16   : > { %p784_p13 = pneg %p783_p12 }
  0x17   : > { %p790_p4 = por %p789_p3, %p788_p2 }
  0x19   : > { %p791_p5 = pnand %p790_p4, %p784_p13 }
  0x1b   : > { %794 = shalt.err (!%p791_p5)
}
  0x1c   : > { %s795_s6 = scalar_lea.vmem %s998_s13, 512  ;;  %s892_s7 = smov [#allocation3]  }
  0x1d   : > { %p796_p6 = scmp.ne.s32.totalorder %s998_s13, %s795_s6  ;;  %s800_s8 = sshll.u32 %s892_s7, 4  ;;  %s801_s8 = int_to_ptr.vmem [resolvable:$false] %s800_s8 }
  0x1e   : > { %s802_s9 = scalar_lea.vmem %s801_s8, 1024  ;;  %p803_p12 = scmp.lt.s32.totalorder %s998_s13, %s801_s8 }
  0x1f   : > { %p798_p8 = pnand %p796_p6, %p782_p11  ;;  %p804_p0 = scmp.lt.s32.totalorder %s802_s9, %s795_s6 }
  0x21   : > { %p799_p10 = pneg %p798_p8  ;;  %p805_p1 = por %p804_p0, %p803_p12 }
  0x23   : > { %p806_p2 = pnand %p805_p1, %p799_p10 }
  0x25   : > { %809 = shalt.err (!%p806_p2)
}
  0x26   : > { %s893_s10 = smov 128   ;;  %s894_s12 = smov 8  }
  0x27   : > { %718 = dma.hbm_to_vmem [thread:$0]  (!%p994_p9), %s990_s11, 512, %s998_s13, %s1000_s15, %s893_s10, %s893_s10, %s894_s12  }
  0x28   : > { %p667_p11 = scmp.ge.s32.totalorder %s890_s23, 1  ;;  %p269_p13 = scmp.lt.s32.totalorder %s890_s23, 5 }
  0x2a   : > { %p270_p3 = pnand %p667_p11, %p269_p13 }
  0x2b   : > { %s275_s16 = sand.u32 (!%p270_p3), 1, %s874_s19  }
  0x2c   : > { %273 = sbr.rel (%p270_p3) target bundleno = 530 (0x212), region = 40  ;;  %s668_s17 = sshll.u32 (!%p270_p3), %s275_s16, 5 }
  0x2d   : > { %s276_s18 = scalar_lea.sflag (!%p270_p3), [#allocation4], %s275_s16  ;;  %s279_s26 = scalar_lea.vmem (!%p270_p3), [#allocation3], %s668_s17 }
  0x33   : > { %861 = dma.done.wait (%p977_p7), %s276_s18, 512  }
  0x34   : > { %863 = vsyncadd (%p977_p7), %s276_s18, 4294966784  ;;  %p328_p4 = scmp.lt.s32.totalorder %s882_s21, 3  ;;  %p670_p9 = scmp.ne.s32.totalorder %s882_s21, 0 }
  0x35   : > { %v344_v0 = vld [vmem:[%s1101_s4] sm:$0xf] (!%p670_p9)  ;;  %vm349_vm0 = vcmask (!%p670_p9), 1043456   ;;  %v895_v2 = vmov (!%p670_p9), 0.0   ;;  %vm896_vm1 = vmmov (!%p670_p9), 0   ;;  %vm345_vm2 = vcmask (!%p670_p9), 31744  }
  0x36   : > { %s329_s14 = scalar_select %p328_p4, %s882_s21, 3 }
  0x37   : > { %342 = sbr.rel (%p670_p9) target bundleno = 270 (0x10e), region = 48  ;;  %v343_v1 = vld [vmem:[%s1098_s1] sm:$0xff] (!%p670_p9)  ;;  %687 = vmatprep.subr.mxu0 (!%p670_p9), %v895_v2  ;;  %689 = vmatprep.mubr.msk.f32.mxu0 (!%p670_p9), %vm896_vm1, %v895_v2  ;;  %vm423_vm3 = vcmask (!%p670_p9), 523264  }
  0x38   : > { %s669_s11 = sshll.u32 %s329_s14, 3  ;;  %688 = vmatpush3.msk.msra.mxu0 (!%p670_p9), %vm349_vm0, %v344_v0 }
  0x39   : > { %s334_s27 = scalar_lea.vmem %s1099_s2, %s669_s11  ;;  %690 = vmatmul.mubr.msk.f32.vlgmr.msra.gmra.mrb[0].mxu0 (!%p670_p9), %vm345_vm2, %v343_v1 }
 0x10c   : > { %v419_v3 = vpop.f32.mrb[0].mxu0 }
 0x10d   : > { %424 = vst.msk [vmem:[#allocation2] sm:$0xff] %vm423_vm3, %v419_v3  ;;  %v691_v4 = vpop.f32.mrb[1].mxu0 }
 0x10e PF: > { %v426_v5 = vld [vmem:[%s279_s26] sm:$0xff]  ;;  %v427_v6 = vld [vmem:[%s279_s26 + $0x8] sm:$0xff]  ;;  %v428_v7 = vld [vmem:[%s279_s26 + $0x10] sm:$0xff]  ;;  %v897_v8 = vmov 0.0|0.0   ;;  %vm898_vm4 = vmmov 0   ;;  %v899_v11 = vmov 0.0  }
 0x10f   : > { %703 = vmatprep.subr.bf16.mxu0 %v897_v8  ;;  %v704_v9 = vpack.c.bf16 %v427_v6, %v426_v5  ;;  %v429_v10 = vld [vmem:[%s279_s26 + $0x18] sm:$0xff]  ;;  %700 = vmatprep.mubr.msk.f32.mxu0 %vm898_vm4, %v899_v11  ;;  %v900_v13 = vmov 0   ;;  %vm430_vm5 = vcmask 261120   ;;  %vm513_vm6 = vcmask 523264   ;;  %p674_p7 = scmp.ne.s32.totalorder %s882_s21, 3 }
 0x110   : > { %v505_v12 = vld [vmem:[%s334_s27] sm:$0xff]  ;;  %779 = vset.pattern.permute.xlu0 %v900_v13  ;;  %v707_v14 = vpack.c.bf16 %v429_v10, %v428_v7 }
 0x111   : > { %705 = vmatpush3.bf16.msra.mxu0 %v704_v9  ;;  %508 = vperm.xlu0 %779, %v505_v12   ;;  %v425_v15 = vld [vmem:[%s1097_s0] sm:$0xff] }
 0x112   : > { %706 = vmatprep.subr.bf16.mxu0 %v897_v8 }
 0x114   : > { %v504_v18 = vld [vmem:[#allocation2] sm:$0xff] }
 0x115   : > { %708 = vmatpush3.bf16.msra.mxu0 %v707_v14 }
 0x118   : > { %701 = vmatmul.mubr.msk.f32.vlgmr.msra.gmra.mrb[0].mxu0 %vm430_vm5, %v425_v15 }
 0x190   : > { %v509_v16 = vpop.permute.xlu0 %508 }
 0x1ea   : > { %518 = sbr.rel (%p674_p7) target bundleno = 505 (0x1f9), region = 52 }
 0x1eb   : > { %v500_v17 = vpop.f32.mrb[0].mxu0 }
 0x1ec   : > { %v511_v19 = vmul.f32 %v509_v16, %v500_v17  ;;  %v702_v20 = vpop.f32.mrb[1].mxu0 }
 0x1ee   : > { %v512_v21 = vadd.f32 %v511_v19, %v504_v18 }
 0x1f0   : > { %514 = vst.msk [vmem:[#allocation2] sm:$0xff] %vm513_vm6, %v512_v21 }
 0x1f7   : > { %v519_v22 = vld [vmem:[#allocation2] sm:$0xff] }
 0x1f8   : > { %520 = vst.msk [vmem:[#allocation6] sm:$0xff] %vm513_vm6, %v519_v22 }
 0x1f9 PF: > { %p1053_p5 = scmp.eq.s32.totalorder %s658_s24, 3  ;;  %s901_s12 = smov [#allocation6]  }
 0x1fa   : > { %s531_s16 = sshll.u32 %s901_s12, 4  ;;  %s532_s16 = int_to_ptr.vmem [resolvable:$true] %s531_s16 }
 0x1fb   : > { %s810_s17 = scalar_lea.vmem %s532_s16, 128  ;;  %p817_p12 = scmp.lt.s32.totalorder %s532_s16, %s532_s16 }
 0x1fc   : > { %p811_p6 = scmp.ne.s32.totalorder %s532_s16, %s810_s17  ;;  %p818_p0 = scmp.lt.s32.totalorder %s810_s17, %s810_s17 }
 0x1fe   : > { %p812_p8 = pnand %p811_p6, %p1053_p5  ;;  %p819_p1 = por %p818_p0, %p817_p12 }
 0x200   : > { %p813_p10 = pneg %p812_p8 }
 0x202   : > { %p820_p2 = pnand %p819_p1, %p813_p10 }
 0x204   : > { %823 = shalt.err (!%p820_p2)
}
 0x205   : > { %s824_s24 = scalar_lea.hbm %s1102_s5, 128 }
 0x206   : > { %p825_p11 = scmp.ne.s32.totalorder %s1102_s5, %s824_s24  ;;  %p830_p4 = scmp.lt.u32.totalorder %s824_s24, %s1102_s5 }
 0x208   : > { %p826_p13 = pnand %p825_p11, %p1053_p5 }
 0x20a   : > { %p827_p3 = pneg %p826_p13 }
 0x20c   : > { %p832_p9 = pnand %p830_p4, %p827_p3 }
 0x20e   : > { %835 = shalt.err (!%p832_p9)
}
 0x20f   : > { %712 = dma.vmem_to_hbm [thread:$0]  (%p1053_p5), %s532_s16, 128, %s1102_s5, [#allocation5]  }
 0x210   : > { %865 = dma.done.wait (%p1053_p5), [#allocation5], 128  }
 0x211   : > { %867 = vsyncadd (%p1053_p5), [#allocation5], 4294967168 }
 0x212 PF: > { %s19_s23 = sadd.s32 1, %s890_s23   ;;  %s1107_s18 = smov %s874_s19 }
 0x213   : > { %p16_p7 = scmp.ge.s32.totalorder %s19_s23, 6   ;;  %s1108_s19 = smov %s878_s20 }
 0x214   : > { %s1109_s20 = smov %s983_s30  ;;  %s1110_s21 = smov %s886_s22 }
 0x215   : > { %s1111_s22 = smov %s1113_s25  ;;  %18 = sbr.rel (!%p16_p7) target bundleno = 5 (0x5), region = 98 }
 0x21c   :  { %544 = vsyncpa [#allocation4], 1 }
 0x21d   :  { %546 = vsyncpa [#allocation4 + $0x1], 1 }
 0x21e   :  { %547 = vsyncpa [#allocation5], 1 }
 0x21f   :  { %549 = vsyncpa [#allocation5 + $0x1], 1 }

</bundles_post_ra>
